<compile_context>
chip_gen: v6e
topology: v6e:2x2x1
jax: 0.10.0
libtpu: 0.0.40
codegen_flags: <defaults>
</compile_context>

<pallas_src>
import jax
import jax.numpy as jnp
from jax.experimental import pallas as pl
from jax.experimental.pallas import tpu as pltpu


def _select_k_kernel(idx_ref, x_ref, o_ref):
    """One grid step: select k seq columns for Bt batches, entirely in VMEM.

    idx_ref: VMEM (Bt, 1, k) int32  -- per-batch column indices
    x_ref:   VMEM (Bt, F, S)        -- input block (original layout, no transpose)
    o_ref:   VMEM (Bt, F, k)        -- output block
    """
    bt, _, S = x_ref.shape
    k = idx_ref.shape[-1]
    # (Bt, S, k) one-hot selection matrix: sel[b, s, j] = (s == idx[b, j]).
    sel = (jax.lax.broadcasted_iota(jnp.int32, (bt, S, k), 1)
           == idx_ref[...]).astype(x_ref.dtype)
    # Batched (F, S) @ (S, k) on the MXU; exact for a 0/1 selection matrix.
    o_ref[...] = jnp.einsum(
        "bfs,bsk->bfk", x_ref[...], sel,
        preferred_element_type=jnp.float32).astype(o_ref.dtype)


def _pick_block_batches(batch, feat, seq, k, itemsize, budget_bytes=4 << 20):
    """Largest divisor of `batch` whose per-step blocks (x + out + idx) fit ~budget.

    Double buffering doubles this, so 4 MiB keeps us well inside the 32 MiB
    scoped-VMEM default on every generation (v7x included).
    """
    per_batch = feat * seq * itemsize + feat * k * itemsize + 4 * k
    bt = int(max(1, min(batch, budget_bytes // max(per_batch, 1))))
    while batch % bt:
        bt -= 1
    return bt


def gather_k(x, idx, *, block_batches=None):
    """x: [B, F, S], idx: [B, k] int32 -> [B, F, k]  (out[b] = x[b, :, idx[b]])."""
    B, Fd, S = x.shape
    k = idx.shape[-1]
    idx3 = idx.reshape(B, 1, k).astype(jnp.int32)
    bt = block_batches or _pick_block_batches(B, Fd, S, k, x.dtype.itemsize)

    return pl.pallas_call(
        _select_k_kernel,
        out_shape=jax.ShapeDtypeStruct((B, Fd, k), x.dtype),
        grid=(B // bt,),
        in_specs=[
            pl.BlockSpec((bt, 1, k), lambda i: (i, 0, 0)),    # indices
            pl.BlockSpec((bt, Fd, S), lambda i: (i, 0, 0)),   # x, original layout
        ],
        out_specs=pl.BlockSpec((bt, Fd, k), lambda i: (i, 0, 0)),
        compiler_params=pltpu.CompilerParams(
            dimension_semantics=("parallel",)),
    )(idx3, x)


def sample_indices(key, batch, seq_len, k):
    """Per-batch randperm(seq_len)[:k] (exact law; no top_k tie-break bias)."""
    keys = jax.random.split(key, batch)
    perms = jax.vmap(lambda kk: jax.random.permutation(kk, seq_len))(keys)
    return perms[:, :k].astype(jnp.int32)


def random_k_pool(x, key, k=5):
    """Forward pass of RandomKPool: [B, F, S] -> [B, F, k]."""
    idx = sample_indices(key, x.shape[0], x.shape[2], k)
    return gather_k(x, idx)


if __name__ == "__main__":
    B, Fd, S, K = 2, 32, 16, 5
    root = jax.random.PRNGKey(0)
    xkey, ikey = jax.random.split(root)
    x = jax.random.normal(xkey, (B, Fd, S), dtype=jnp.float32)

    out = jax.block_until_ready(random_k_pool(x, ikey, k=K))
    assert out.shape == (B, Fd, K), out.shape

    # Pure-JAX reference gather using the same (deterministic) indices.
    idx = sample_indices(ikey, B, S, K)
    ref = jnp.stack([x[b][:, idx[b]] for b in range(B)], axis=0)   # [B, F, k]
    assert jnp.allclose(out, ref), "kernel output mismatches reference gather"

    print("KERNEL_OK")
</pallas_src>

<mosaic_0001>
module attributes {stable_mosaic.version = 11 : i64} {
  func.func @_select_k_kernel(%arg0: i32, %arg1: memref<2x1x5xi32, #tpu.memory_space<vmem>>, %arg2: memref<2x32x16xf32, #tpu.memory_space<vmem>>, %arg3: memref<2x32x5xf32, #tpu.memory_space<vmem>>) attributes {dimension_semantics = [#tpu.dimension_semantics<parallel>], iteration_bounds = array<i64: 1>, scalar_prefetch = 0 : i64, scratch_operands = 0 : i64, tpu.core_type = #tpu.core_type<tc>, window_params = [{transform_indices = @transform_0, window_bounds = array<i64: 2, 1, 5>}, {transform_indices = @transform_1, window_bounds = array<i64: 2, 32, 16>}, {transform_indices = @transform_2, window_bounds = array<i64: 2, 32, 5>}]} {
    %0 = tpu.iota {dimensions = array<i32: 1>} : vector<2x16x5xi32>
    %c0 = arith.constant 0 : index
    %c0_0 = arith.constant 0 : index
    %c0_1 = arith.constant 0 : index
    %1 = vector.load %arg1[%c0, %c0_0, %c0_1] : memref<2x1x5xi32, #tpu.memory_space<vmem>>, vector<2x1x5xi32>
    %2 = vector.broadcast %1 : vector<2x1x5xi32> to vector<2x16x5xi32>
    %3 = arith.cmpi eq, %0, %2 : vector<2x16x5xi32>
    %4 = arith.extui %3 : vector<2x16x5xi1> to vector<2x16x5xi32>
    %5 = arith.sitofp %4 : vector<2x16x5xi32> to vector<2x16x5xf32>
    %c0_2 = arith.constant 0 : index
    %c0_3 = arith.constant 0 : index
    %c0_4 = arith.constant 0 : index
    %6 = vector.load %arg2[%c0_2, %c0_3, %c0_4] : memref<2x32x16xf32, #tpu.memory_space<vmem>>, vector<2x32x16xf32>
    "tpu.trace_start"() <{level = 10 : i32, message = "bfs,bsk->bfk"}> : () -> ()
    %cst = arith.constant dense<0.000000e+00> : vector<2x32x5xf32>
    %7 = tpu.matmul %6, %5, %cst {dimension_numbers = #tpu.dot_dimension_numbers<[2], [1], [1], [2], [0, 0, 0, 1, 1, 2], [0], [0]>} : vector<2x32x16xf32>, vector<2x16x5xf32>, vector<2x32x5xf32> -> vector<2x32x5xf32>
    "tpu.trace_stop"() : () -> ()
    %c0_5 = arith.constant 0 : index
    %c0_6 = arith.constant 0 : index
    %c0_7 = arith.constant 0 : index
    %8 = vector.load %arg3[%c0_5, %c0_6, %c0_7] : memref<2x32x5xf32, #tpu.memory_space<vmem>>, vector<2x32x5xf32>
    tpu.vector_store %arg3[%c0_5, %c0_6, %c0_7], %7 {strides = array<i32>} : memref<2x32x5xf32, #tpu.memory_space<vmem>>, vector<2x32x5xf32>,
    return
  }
  func.func @transform_0(%arg0: i32) -> (i32, i32, i32) {
    %c0_i32 = arith.constant 0 : i32
    %c0_i32_0 = arith.constant 0 : i32
    %c0_i32_1 = arith.constant 0 : i32
    return %arg0, %c0_i32, %c0_i32_0 : i32, i32, i32
  }
  func.func @transform_1(%arg0: i32) -> (i32, i32, i32) {
    %c0_i32 = arith.constant 0 : i32
    %c0_i32_0 = arith.constant 0 : i32
    %c0_i32_1 = arith.constant 0 : i32
    return %arg0, %c0_i32, %c0_i32_0 : i32, i32, i32
  }
  func.func @transform_2(%arg0: i32) -> (i32, i32, i32) {
    %c0_i32 = arith.constant 0 : i32
    %c0_i32_0 = arith.constant 0 : i32
    %c0_i32_1 = arith.constant 0 : i32
    return %arg0, %c0_i32, %c0_i32_0 : i32, i32, i32
  }
}

</mosaic_0001>

<bundles_post_ra>
// kernel: tpu_custom_call.1
= control target key start
LH: loop header
LB: loop body
LE: loop exit
PB: predicated region body
PF: predicated region fallthrough
CT: control target
= control target key end

     0   :  { %v11_v0 = vlaneseq  ;;  %vm44_vm0 = vcmask 130048   ;;  %v303_v7 = vmov 1.0   ;;  %vm239_vm5 = vcmask 39936   ;;  %s389_s0 = inlined_call_operand.vmem [shape: s32[2,1,5], index: 0, kind: input, shape index: {}]   ;;  %s390_s1 = inlined_call_operand.vmem [shape: f32[2,32,16], index: 1, kind: input, shape index: {}]   ;;  %s391_s2 = inlined_call_operand.vmem [shape: f32[2,32,5], index: 2, kind: output, shape index: {}]  }
   0x1   :  { %v36_v1 = vld [vmem:[%s390_s1] sm:$0xff]  ;;  %v37_v8 = vld [vmem:[%s390_s1 + $0x8] sm:$0xff]  ;;  %v38_v10 = vld [vmem:[%s390_s1 + $0x10] sm:$0xff] }
   0x2   :  { %v12_v2 = vshrl.u32 %v11_v0, 7  ;;  %286 = vmatprep.mubr.msk.f32.mxu0 %vm44_vm0, %v36_v1  ;;  %v40_v3 = vld [vmem:[%s390_s1 + $0x20] sm:$0xff]  ;;  %v41_v9 = vld [vmem:[%s390_s1 + $0x28] sm:$0xff]  ;;  %v42_v11 = vld [vmem:[%s390_s1 + $0x30] sm:$0xff] }
   0x3   :  { %v252_v4 = vld [vmem:[%s389_s0] ss:$0 sm:$0xff]  ;;  %v253_v5 = vld [vmem:[%s389_s0 + $0x1] ss:$0 sm:$0xff]  ;;  %296 = vmatprep.mubr.msk.f32.mxu1 %vm44_vm0, %v40_v3  ;;  %v39_v12 = vld [vmem:[%s390_s1 + $0x18] sm:$0xff] }
   0x4   :  { %v13_v6 = vadd.s32 8, %v12_v2  ;;  %vm24_vm1 = vcmp.eq.s32.totalorder %v12_v2, %v252_v4  ;;  %vm26_vm3 = vcmp.eq.s32.totalorder %v12_v2, %v253_v5  ;;  %v43_v13 = vld [vmem:[%s390_s1 + $0x38] sm:$0xff] }
   0x6   :  { %vm25_vm2 = vcmp.eq.s32.totalorder %v13_v6, %v252_v4  ;;  %vm27_vm4 = vcmp.eq.s32.totalorder %v13_v6, %v253_v5 }
   0x7   :  { %282 = vmatprep.subr.msk.mxu0 %vm25_vm2, %v303_v7  ;;  %292 = vmatprep.subr.msk.mxu1 %vm27_vm4, %v303_v7 }
   0x8   :  { %283 = vmatpush3.msk.msra.mxu0 %vm25_vm2, %v303_v7  ;;  %293 = vmatpush3.msk.msra.mxu1 %vm27_vm4, %v303_v7 }
   0x9   :  { %284 = vmatprep.subr.msk.mxu0 %vm24_vm1, %v303_v7  ;;  %294 = vmatprep.subr.msk.mxu1 %vm26_vm3, %v303_v7 }
   0xa   :  { %285 = vmatpush3.msk.msra.mxu0 %vm24_vm1, %v303_v7  ;;  %295 = vmatpush3.msk.msra.mxu1 %vm26_vm3, %v303_v7 }
   0xb   :  { %287 = vmatmul.mubr.msk.f32.vlgmr.msra.gmra.mxu0 %vm44_vm0, %v37_v8  ;;  %297 = vmatmul.mubr.msk.f32.vlgmr.msra.gmra.mxu1 %vm44_vm0, %v41_v9 }
   0xc   :  { %289 = vmatprep.mubr.msk.f32.mxu0 %vm44_vm0, %v38_v10  ;;  %299 = vmatprep.mubr.msk.f32.mxu1 %vm44_vm0, %v42_v11 }
   0xf   :  { %290 = vmatmul.mubr.msk.f32.gmra.mxu0 %vm44_vm0, %v39_v12  ;;  %300 = vmatmul.mubr.msk.f32.gmra.mxu1 %vm44_vm0, %v43_v13 }
  0xcb   :  { %v288_v14 = vpop.f32.mrf.mxu0  ;;  %v298_v15 = vpop.f32.mrf.mxu1 }
  0xcc   :  { %241 = vst.msk [vmem:[%s391_s2 + $0x8] sm:$0xff] %vm239_vm5, %v288_v14  ;;  %245 = vst.msk [vmem:[%s391_s2 + $0x28] sm:$0xff] %vm239_vm5, %v298_v15 }
  0xcd   :  { %v123_v16 = vpop.f32.mrf.mxu0  ;;  %v220_v17 = vpop.f32.mrf.mxu1 }
  0xce   :  { %240 = vst.msk [vmem:[%s391_s2] sm:$0xff] %vm239_vm5, %v123_v16  ;;  %244 = vst.msk [vmem:[%s391_s2 + $0x20] sm:$0xff] %vm239_vm5, %v220_v17 }
  0xcf   :  { %v291_v18 = vpop.f32.mrf.mxu0  ;;  %v301_v19 = vpop.f32.mrf.mxu1 }
  0xd0   :  { %243 = vst.msk [vmem:[%s391_s2 + $0x18] sm:$0xff] %vm239_vm5, %v291_v18  ;;  %247 = vst.msk [vmem:[%s391_s2 + $0x38] sm:$0xff] %vm239_vm5, %v301_v19 }
  0xd1   :  { %v133_v20 = vpop.f32.mrf.mxu0  ;;  %v230_v21 = vpop.f32.mrf.mxu1 }
  0xd2   :  { %242 = vst.msk [vmem:[%s391_s2 + $0x10] sm:$0xff] %vm239_vm5, %v133_v20  ;;  %246 = vst.msk [vmem:[%s391_s2 + $0x30] sm:$0xff] %vm239_vm5, %v230_v21 }

</bundles_post_ra>
